<compile_context>
chip_gen: v7x
topology: tpu7x:2x2x1
jax: 0.10.0
libtpu: 0.0.40
codegen_flags: <defaults>
</compile_context>

<pallas_src>
import functools
import math

import jax
import jax.numpy as jnp
from jax import lax
from jax.experimental import pallas as pl
from jax.experimental.pallas import tpu as pltpu


# ----------------------------------------------------------------------------- #
# Kernel
# ----------------------------------------------------------------------------- #
def _arcmargin_kernel(x_ref, w_ref, xinv_ref, winv_ref, label_ref, o_ref, *,
                      s, cos_m, sin_m, th, mm, easy_margin, tc):
    # x_ref:    (TB, D)  matmul dtype (bf16 or f32)
    # w_ref:    (TC, D)  matmul dtype
    # xinv_ref: (TB, 1)  f32   1 / max(||x_row||, eps)
    # winv_ref: (1, TC)  f32   1 / max(||w_row||, eps)
    # label_ref:(TB, 1)  int32
    # o_ref:    (TB, TC) f32
    dots = lax.dot_general(
        x_ref[...], w_ref[...],
        dimension_numbers=(((1,), (1,)), ((), ())),   # contract feature axis
        preferred_element_type=jnp.float32,
    )
    # Post-matmul normalization: per-row and per-column inverse-norm scaling.
    cosine = dots * xinv_ref[...] * winv_ref[...]

    # One-hot blend via globally-offset column compare (correct under C tiling).
    j = pl.program_id(0)                              # class-tile axis is grid dim 0
    col_ids = j * tc + lax.broadcasted_iota(jnp.int32, cosine.shape, 1)
    is_target = col_ids == label_ref[...]             # (TB,1) broadcasts over lanes

    # Margin arithmetic (f32), clamped before the sqrt to avoid NaN at |cos| ~ 1.
    sine = jnp.sqrt(jnp.maximum(1.0 - cosine * cosine, 0.0))
    phi = cosine * cos_m - sine * sin_m
    if easy_margin:
        phi = jnp.where(cosine > 0.0, phi, cosine)
    else:
        phi = jnp.where(cosine > th, phi, cosine - mm)

    o_ref[...] = (jnp.where(is_target, phi, cosine) * s).astype(o_ref.dtype)


# ----------------------------------------------------------------------------- #
# Wrapper
# ----------------------------------------------------------------------------- #
def _pick_tile(dim, target, align):
    """Largest block size <= target that satisfies the (8,128) constraint."""
    if dim <= target:
        return dim                      # full dim is always a legal block extent
    return max((target // align) * align, align)


def _fit_tiles_to_vmem(tb, tc, d, mm_itemsize, budget_bytes):
    """Shrink tiles (class axis first) until double-buffered working set fits."""
    def est(tb_, tc_):
        return 2 * (tb_ * d * mm_itemsize          # x tile (double buffered)
                    + tc_ * d * mm_itemsize        # weight tile
                    + tb_ * tc_ * 4)               # f32 output tile
    while est(tb, tc) > budget_bytes and tc > 128:
        tc = max(tc // 2, 128)
    while est(tb, tc) > budget_bytes and tb > 8:
        tb = max(tb // 2, 8)
    return tb, tc


def arc_margin_product(x, weight, label, *, s=30.0, m=0.5, easy_margin=False,
                       matmul_dtype=jnp.bfloat16,
                       tile_b_target=512, tile_c_target=2048):
    """ArcMarginProduct.forward(input, label) with aug_hard_samples=False.

    x:      (B, in_features)
    weight: (out_features, in_features)
    label:  (B,) integer class ids
    returns (B, out_features) float32
    """
    B, D = x.shape
    C, D2 = weight.shape
    assert D == D2

    cos_m = math.cos(m)
    sin_m = math.sin(m)
    th = math.cos(math.pi - m)
    mm = math.sin(math.pi - m) * m
    eps = 1e-12                                    # F.normalize default eps

    x32 = x.astype(jnp.float32)
    w32 = weight.astype(jnp.float32)

    # Precompute inverse L2 norms once (tiny side inputs), matching
    # F.normalize's x / max(||x||, eps) semantics exactly.
    x_inv = 1.0 / jnp.maximum(
        jnp.sqrt(jnp.sum(x32 * x32, axis=1, keepdims=True)), eps)        # (B, 1)
    w_inv = (1.0 / jnp.maximum(
        jnp.sqrt(jnp.sum(w32 * w32, axis=1)), eps)).reshape(1, C)         # (1, C)

    xm = x32.astype(matmul_dtype)
    wm = w32.astype(matmul_dtype)
    label2d = label.reshape(B, 1).astype(jnp.int32)

    # Tile sizes: sublane-aligned batch tile, lane-aligned class tile, kept inside a
    # conservative 24 MiB double-buffered VMEM budget (safe on v5e/v6e/v7x defaults).
    tb = _pick_tile(B, tile_b_target, 8)
    tc = _pick_tile(C, tile_c_target, 128)
    mm_itemsize = jnp.dtype(matmul_dtype).itemsize
    if B > tb or C > tc:
        tb, tc = _fit_tiles_to_vmem(tb, tc, D, mm_itemsize, 24 * 1024 * 1024)

    # Class-tile axis OUTER: each weight tile streamed from HBM exactly once.
    grid = (pl.cdiv(C, tc), pl.cdiv(B, tb))

    kernel = functools.partial(
        _arcmargin_kernel,
        s=float(s), cos_m=cos_m, sin_m=sin_m, th=th, mm=mm,
        easy_margin=bool(easy_margin), tc=tc,
    )

    cost = pl.CostEstimate(
        flops=2 * B * C * D + 8 * B * C,
        transcendentals=B * C,                      # sqrt per output element
        bytes_accessed=(B * D + C * D) * mm_itemsize + B * C * 4,
    )

    return pl.pallas_call(
        kernel,
        out_shape=jax.ShapeDtypeStruct((B, C), jnp.float32),
        grid_spec=pltpu.PrefetchScalarGridSpec(
            num_scalar_prefetch=0,
            grid=grid,
            in_specs=[
                pl.BlockSpec((tb, D), lambda j, i: (i, 0)),   # x tile
                pl.BlockSpec((tc, D), lambda j, i: (j, 0)),   # weight tile
                pl.BlockSpec((tb, 1), lambda j, i: (i, 0)),   # x inverse norms
                pl.BlockSpec((1, tc), lambda j, i: (0, j)),   # w inverse norms
                pl.BlockSpec((tb, 1), lambda j, i: (i, 0)),   # labels
            ],
            out_specs=pl.BlockSpec((tb, tc), lambda j, i: (i, j)),
        ),
        compiler_params=pltpu.CompilerParams(
            dimension_semantics=("parallel", "parallel"),
        ),
        cost_estimate=cost,
    )(xm, wm, x_inv, w_inv, label2d)


# ----------------------------------------------------------------------------- #
# Pure-JAX reference for sanity checking
# ----------------------------------------------------------------------------- #
def _reference(x, weight, label, *, s=30.0, m=0.5, easy_margin=False):
    eps = 1e-12
    xn = x / jnp.maximum(jnp.linalg.norm(x, axis=1, keepdims=True), eps)
    wn = weight / jnp.maximum(jnp.linalg.norm(weight, axis=1, keepdims=True), eps)
    cosine = xn @ wn.T
    one_hot = jax.nn.one_hot(label, weight.shape[0], dtype=jnp.float32)
    sine = jnp.sqrt(jnp.maximum(1.0 - cosine ** 2, 0.0))
    phi = cosine * math.cos(m) - sine * math.sin(m)
    th = math.cos(math.pi - m)
    mm = math.sin(math.pi - m) * m
    if easy_margin:
        phi = jnp.where(cosine > 0.0, phi, cosine)
    else:
        phi = jnp.where(cosine > th, phi, cosine - mm)
    return (one_hot * phi + (1.0 - one_hot) * cosine) * s


# ----------------------------------------------------------------------------- #
# Main
# ----------------------------------------------------------------------------- #
if __name__ == "__main__":
    key = jax.random.PRNGKey(0)
    kx, kw, kl = jax.random.split(key, 3)

    B = 8                 # batch
    in_features = 32      # embedding size
    out_features = 128    # number of classes (lane-friendly)

    x = jax.random.normal(kx, (B, in_features), dtype=jnp.float32)

    # Deterministic Xavier-uniform init for weight (out_features, in_features).
    fan_in, fan_out = in_features, out_features
    limit = math.sqrt(6.0 / (fan_in + fan_out))
    weight = jax.random.uniform(
        kw, (out_features, in_features), dtype=jnp.float32,
        minval=-limit, maxval=limit)

    label = jax.random.randint(kl, (B,), 0, out_features, dtype=jnp.int32)

    ref = _reference(x, weight, label, s=30.0, m=0.5, easy_margin=False)

    # Exact-semantics check: f32 matmul operands, tight tolerance.
    out_f32 = arc_margin_product(x, weight, label, s=30.0, m=0.5,
                                 easy_margin=False, matmul_dtype=jnp.float32)
    out_f32 = jax.block_until_ready(out_f32)
    assert out_f32.shape == (B, out_features)
    assert jnp.allclose(out_f32, ref, atol=2e-3, rtol=1e-4), "f32 path mismatch"

    # Default fast path: bf16 matmul operands (f32 accumulate), looser tolerance.
    out_bf16 = arc_margin_product(x, weight, label, s=30.0, m=0.5,
                                  easy_margin=False)
    out_bf16 = jax.block_until_ready(out_bf16)
    assert out_bf16.shape == (B, out_features)
    assert jnp.allclose(out_bf16, ref, atol=3e-1, rtol=2e-2), "bf16 path mismatch"

    # easy_margin branch coverage.
    ref_em = _reference(x, weight, label, s=30.0, m=0.5, easy_margin=True)
    out_em = arc_margin_product(x, weight, label, s=30.0, m=0.5,
                                easy_margin=True, matmul_dtype=jnp.float32)
    out_em = jax.block_until_ready(out_em)
    assert jnp.allclose(out_em, ref_em, atol=2e-3, rtol=1e-4), "easy_margin mismatch"

    print("KERNEL_OK")
</pallas_src>

<mosaic_0001>
module attributes {stable_mosaic.version = 11 : i64} {
  func.func @_arcmargin_kernel(%arg0: i32, %arg1: i32, %arg2: memref<8x32xf32, #tpu.memory_space<vmem>>, %arg3: memref<128x32xf32, #tpu.memory_space<vmem>>, %arg4: memref<8x1xf32, #tpu.memory_space<vmem>>, %arg5: memref<1x128xf32, #tpu.memory_space<vmem>>, %arg6: memref<8x1xi32, #tpu.memory_space<vmem>>, %arg7: memref<8x128xf32, #tpu.memory_space<vmem>>) attributes {dimension_semantics = [#tpu.dimension_semantics<parallel>, #tpu.dimension_semantics<parallel>], iteration_bounds = array<i64: 1, 1>, scalar_prefetch = 0 : i64, scratch_operands = 0 : i64, tpu.core_type = #tpu.core_type<tc>, window_params = [{transform_indices = @transform_0, window_bounds = array<i64: 8, 32>}, {transform_indices = @transform_1, window_bounds = array<i64: 128, 32>}, {transform_indices = @transform_2, window_bounds = array<i64: 8, 1>}, {transform_indices = @transform_3, window_bounds = array<i64: 1, 128>}, {transform_indices = @transform_4, window_bounds = array<i64: 8, 1>}, {transform_indices = @transform_5, window_bounds = array<i64: 8, 128>}]} {
    %c0 = arith.constant 0 : index
    %c0_0 = arith.constant 0 : index
    %0 = vector.load %arg2[%c0, %c0_0] : memref<8x32xf32, #tpu.memory_space<vmem>>, vector<8x32xf32>
    %c0_1 = arith.constant 0 : index
    %c0_2 = arith.constant 0 : index
    %1 = vector.load %arg3[%c0_1, %c0_2] : memref<128x32xf32, #tpu.memory_space<vmem>>, vector<128x32xf32>
    %cst = arith.constant dense<0.000000e+00> : vector<8x128xf32>
    %2 = tpu.matmul %0, %1, %cst {dimension_numbers = #tpu.dot_dimension_numbers<[1], [1], [0], [0], [0, 0, 1, 0], [], []>} : vector<8x32xf32>, vector<128x32xf32>, vector<8x128xf32> -> vector<8x128xf32>
    %c0_3 = arith.constant 0 : index
    %c0_4 = arith.constant 0 : index
    %3 = vector.load %arg4[%c0_3, %c0_4] : memref<8x1xf32, #tpu.memory_space<vmem>>, vector<8x1xf32>
    %4 = vector.broadcast %3 : vector<8x1xf32> to vector<8x128xf32>
    %5 = arith.mulf %2, %4 : vector<8x128xf32>
    %c0_5 = arith.constant 0 : index
    %c0_6 = arith.constant 0 : index
    %6 = vector.load %arg5[%c0_5, %c0_6] : memref<1x128xf32, #tpu.memory_space<vmem>>, vector<1x128xf32>
    %7 = vector.broadcast %6 : vector<1x128xf32> to vector<8x128xf32>
    %8 = arith.mulf %5, %7 : vector<8x128xf32>
    %c128_i32 = arith.constant 128 : i32
    %9 = arith.muli %arg0, %c128_i32 : i32
    %10 = tpu.iota {dimensions = array<i32: 1>} : vector<8x128xi32>
    %11 = vector.broadcast %9 : i32 to vector<8x128xi32>
    %12 = arith.addi %11, %10 : vector<8x128xi32>
    %c0_7 = arith.constant 0 : index
    %c0_8 = arith.constant 0 : index
    %13 = vector.load %arg6[%c0_7, %c0_8] : memref<8x1xi32, #tpu.memory_space<vmem>>, vector<8x1xi32>
    %14 = vector.broadcast %13 : vector<8x1xi32> to vector<8x128xi32>
    %15 = arith.cmpi eq, %12, %14 : vector<8x128xi32>
    %16 = arith.mulf %8, %8 : vector<8x128xf32>
    %cst_9 = arith.constant 1.000000e+00 : f32
    %17 = vector.broadcast %cst_9 : f32 to vector<8x128xf32>
    %18 = arith.subf %17, %16 : vector<8x128xf32>
    %cst_10 = arith.constant 0.000000e+00 : f32
    %19 = vector.broadcast %cst_10 : f32 to vector<8x128xf32>
    %20 = arith.maximumf %18, %19 : vector<8x128xf32>
    %21 = math.sqrt %20 : vector<8x128xf32>
    %cst_11 = arith.constant 0.87758255 : f32
    %22 = vector.broadcast %cst_11 : f32 to vector<8x128xf32>
    %23 = arith.mulf %8, %22 : vector<8x128xf32>
    %cst_12 = arith.constant 0.47942555 : f32
    %24 = vector.broadcast %cst_12 : f32 to vector<8x128xf32>
    %25 = arith.mulf %21, %24 : vector<8x128xf32>
    %26 = arith.subf %23, %25 : vector<8x128xf32>
    %cst_13 = arith.constant -0.87758255 : f32
    %27 = vector.broadcast %cst_13 : f32 to vector<8x128xf32>
    %28 = arith.cmpf ogt, %8, %27 : vector<8x128xf32>
    %cst_14 = arith.constant 0.239712775 : f32
    %29 = vector.broadcast %cst_14 : f32 to vector<8x128xf32>
    %30 = arith.subf %8, %29 : vector<8x128xf32>
    %31 = arith.select %28, %26, %30 : vector<8x128xi1>, vector<8x128xf32>
    %32 = arith.select %15, %31, %8 : vector<8x128xi1>, vector<8x128xf32>
    %cst_15 = arith.constant 3.000000e+01 : f32
    %33 = vector.broadcast %cst_15 : f32 to vector<8x128xf32>
    %34 = arith.mulf %32, %33 : vector<8x128xf32>
    %c0_16 = arith.constant 0 : index
    %c0_17 = arith.constant 0 : index
    %35 = vector.load %arg7[%c0_16, %c0_17] : memref<8x128xf32, #tpu.memory_space<vmem>>, vector<8x128xf32>
    tpu.vector_store %arg7[%c0_16, %c0_17], %34 {strides = array<i32>} : memref<8x128xf32, #tpu.memory_space<vmem>>, vector<8x128xf32>,
    return
  }
  func.func @transform_0(%arg0: i32, %arg1: i32) -> (i32, i32) {
    %c0_i32 = arith.constant 0 : i32
    %c0_i32_0 = arith.constant 0 : i32
    return %arg1, %c0_i32 : i32, i32
  }
  func.func @transform_1(%arg0: i32, %arg1: i32) -> (i32, i32) {
    %c0_i32 = arith.constant 0 : i32
    %c0_i32_0 = arith.constant 0 : i32
    return %arg0, %c0_i32 : i32, i32
  }
  func.func @transform_2(%arg0: i32, %arg1: i32) -> (i32, i32) {
    %c0_i32 = arith.constant 0 : i32
    %c0_i32_0 = arith.constant 0 : i32
    return %arg1, %c0_i32 : i32, i32
  }
  func.func @transform_3(%arg0: i32, %arg1: i32) -> (i32, i32) {
    %c0_i32 = arith.constant 0 : i32
    %c0_i32_0 = arith.constant 0 : i32
    return %c0_i32, %arg0 : i32, i32
  }
  func.func @transform_4(%arg0: i32, %arg1: i32) -> (i32, i32) {
    %c0_i32 = arith.constant 0 : i32
    %c0_i32_0 = arith.constant 0 : i32
    return %arg1, %c0_i32 : i32, i32
  }
  func.func @transform_5(%arg0: i32, %arg1: i32) -> (i32, i32) {
    %c0_i32 = arith.constant 0 : i32
    return %arg1, %arg0 : i32, i32
  }
}

</mosaic_0001>

<bundles_post_ra>
// kernel: tpu_custom_call.1
= control target key start
LH: loop header
LB: loop body
LE: loop exit
PB: predicated region body
PF: predicated region fallthrough
CT: control target
= control target key end

     0   :  { %vm38_vm0 = vcmask 261120   ;;  %v353_v2 = vmov 0.0|0.0   ;;  %vm354_vm2 = vmmov 0   ;;  %v355_v5 = vmov 0.0   ;;  %s483_s0 = inlined_call_operand.vmem [shape: f32[8,32], index: 0, kind: input, shape index: {}]   ;;  %s484_s1 = inlined_call_operand.vmem [shape: f32[128,32], index: 1, kind: input, shape index: {}]   ;;  %s485_s2 = inlined_call_operand.vmem [shape: f32[8,1], index: 2, kind: input, shape index: {}]   ;;  %s486_s3 = inlined_call_operand.vmem [shape: f32[1,128], index: 3, kind: input, shape index: {}]   ;;  %s487_s4 = inlined_call_operand.vmem [shape: s32[8,1], index: 4, kind: input, shape index: {}]   ;;  %s488_s5 = inlined_call_operand.hbm [shape: f32[8,128], index: 5, kind: output, shape index: {}]  }
   0x1   :  { %v22_v0 = vld [vmem:[%s484_s1] sm:$0xff]  ;;  %v23_v1 = vld [vmem:[%s484_s1 + $0x8] sm:$0xff]  ;;  %289 = vmatprep.subr.bf16.mxu0 %v353_v2  ;;  %vm396_vm1 = vmpackc.low %vm38_vm0, %vm38_vm0  ;;  %286 = vmatprep.mubr.msk.f32.mxu0 %vm354_vm2, %v355_v5  ;;  %v356_v6 = vmov 0  }
   0x2   :  { %v290_v3 = vpack.c.bf16 %v23_v1, %v22_v0  ;;  %326 = vset.pattern.permute.xlu0 %v356_v6  ;;  %v24_v7 = vld [vmem:[%s484_s1 + $0x10] sm:$0xff]  ;;  %v25_v8 = vld [vmem:[%s484_s1 + $0x18] sm:$0xff]  ;;  %v160_v9 = vld [vmem:[%s485_s2] sm:$0xff] }
   0x4   :  { %292 = vmatpush3.bf16.xpose.msk.msra.mxu0 %vm396_vm1, %v290_v3 }
   0x5   :  { %293 = vmatprep.subr.bf16.mxu0 %v353_v2 }
   0x6   :  { %10 = vsyncpa [#allocation3], 0  ;;  %v294_v10 = vpack.c.bf16 %v25_v8, %v24_v7  ;;  %163 = vperm.xlu0 %326, %v160_v9   ;;  %v180_v11 = vld [vmem:[%s487_s4] sm:$0xff]  ;;  %v27_v13 = vld [vmem:[%s484_s1 + $0x28] sm:$0xff]  ;;  %v176_v41 = vlaneseq }
   0x7   :  { %v26_v12 = vld [vmem:[%s484_s1 + $0x20] sm:$0xff]  ;;  %v28_v15 = vld [vmem:[%s484_s1 + $0x30] sm:$0xff]  ;;  %v29_v16 = vld [vmem:[%s484_s1 + $0x38] sm:$0xff] }
   0x8   :  { %v298_v14 = vpack.c.bf16 %v27_v13, %v26_v12  ;;  %v302_v17 = vpack.c.bf16 %v29_v16, %v28_v15  ;;  %v30_v18 = vld [vmem:[%s484_s1 + $0x40] sm:$0xff]  ;;  %v31_v19 = vld [vmem:[%s484_s1 + $0x48] sm:$0xff]  ;;  %v32_v21 = vld [vmem:[%s484_s1 + $0x50] sm:$0xff]  ;;  %v177_v46 = vand.u32 127, %v176_v41 }
   0x9   :  { %v306_v20 = vpack.c.bf16 %v31_v19, %v30_v18  ;;  %v33_v22 = vld [vmem:[%s484_s1 + $0x58] sm:$0xff]  ;;  %v34_v24 = vld [vmem:[%s484_s1 + $0x60] sm:$0xff]  ;;  %v35_v25 = vld [vmem:[%s484_s1 + $0x68] sm:$0xff] }
   0xa   :  { %182 = vperm.xlu0 %326, %v180_v11   ;;  %v310_v23 = vpack.c.bf16 %v33_v22, %v32_v21  ;;  %v314_v26 = vpack.c.bf16 %v35_v25, %v34_v24  ;;  %v36_v27 = vld [vmem:[%s484_s1 + $0x70] sm:$0xff]  ;;  %v37_v28 = vld [vmem:[%s484_s1 + $0x78] sm:$0xff]  ;;  %v21_v30 = vld [vmem:[%s483_s0] sm:$0xff]  ;;  %s357_s0 = smov [#allocation2]  }
   0xb   :  { %v318_v29 = vpack.c.bf16 %v37_v28, %v36_v27  ;;  %v235_v33 = vld [vmem:[%s486_s3] ss:$0 sm:$0xff]  ;;  %s210_s1 = sshll.u32 %s357_s0, 4  ;;  %s211_s1 = int_to_ptr.vmem [resolvable:$true] %s210_s1 }
   0xc   :  { %296 = vmatpush3.bf16.xpose.msk.msra.mxu0 %vm396_vm1, %v294_v10  ;;  %s329_s3 = scalar_lea.vmem %s211_s1, 128  ;;  %p334_p1 = scmp.lt.s32.totalorder %s211_s1, %s211_s1 }
   0xd   :  { %297 = vmatprep.subr.bf16.mxu0 %v353_v2  ;;  %p330_p0 = scmp.ne.s32.totalorder %s211_s1, %s329_s3  ;;  %p335_p2 = scmp.lt.s32.totalorder %s329_s3, %s329_s3 }
   0xf   :  { %p336_p3 = por %p335_p2, %p334_p1 }
  0x11   :  { %p337_p4 = pnand %p336_p3, %p330_p0 }
  0x14   :  { %300 = vmatpush3.bf16.xpose.msk.msra.mxu0 %vm396_vm1, %v298_v14 }
  0x15   :  { %301 = vmatprep.subr.bf16.mxu0 %v353_v2 }
  0x1c   :  { %304 = vmatpush3.bf16.xpose.msk.msra.mxu0 %vm396_vm1, %v302_v17 }
  0x1d   :  { %305 = vmatprep.subr.bf16.mxu0 %v353_v2 }
  0x24   :  { %308 = vmatpush3.bf16.xpose.msk.msra.mxu0 %vm396_vm1, %v306_v20 }
  0x25   :  { %309 = vmatprep.subr.bf16.mxu0 %v353_v2 }
  0x2c   :  { %312 = vmatpush3.bf16.xpose.msk.msra.mxu0 %vm396_vm1, %v310_v23 }
  0x2d   :  { %313 = vmatprep.subr.bf16.mxu0 %v353_v2 }
  0x34   :  { %316 = vmatpush3.bf16.xpose.msk.msra.mxu0 %vm396_vm1, %v314_v26 }
  0x35   :  { %317 = vmatprep.subr.bf16.mxu0 %v353_v2 }
  0x3c   :  { %320 = vmatpush3.bf16.xpose.msk.msra.mxu0 %vm396_vm1, %v318_v29 }
  0x43   :  { %287 = vmatmul.mubr.msk.f32.vlgmr.msra.gmra.mrb[0].mxu0 %vm38_vm0, %v21_v30 }
  0x85   :  { %v164_v31 = vpop.permute.xlu0 %163 }
  0x89   :  { %v183_v49 = vpop.permute.xlu0 %182 }
  0x8a   :  { %vm184_vm6 = vcmp.eq.s32.totalorder %v177_v46, %v183_v49 }
 0x116   :  { %v156_v32 = vpop.f32.mrb[0].mxu0 }
 0x117   :  { %v166_v34 = vmul.f32 %v164_v31, %v156_v32  ;;  %v288_v35 = vpop.f32.mrb[1].mxu0 }
 0x119   :  { %v174_v36 = vmul.f32 %v235_v33, %v166_v34 }
 0x11b   :  { %v185_v37 = vmul.f32 %v174_v36, %v174_v36  ;;  %v195_v47 = vmul.f32 0.87758255, %v174_v36  ;;  %v236_v51 = vadd.f32 -0.23971277, %v174_v36  ;;  %vm198_vm5 = vcmp.gt.f32.partialorder %v174_v36, -0.87758255 }
 0x11d   :  { %v186_v38 = vsub.f32 1.0, %v185_v37 }
 0x11f   :  { %v187_v39 = vmax.f32 %v186_v38, 0.0 }
 0x121   :  { %327 = vrsqrt.f32 %v187_v39  ;;  %vm190_vm3 = vcmp.eq.f32.partialorder %v187_v39, inf  ;;  %v193_v43 = vand.u32 2147483648, %v187_v39  ;;  %vm192_vm4 = vcmp.eq.f32.partialorder %v187_v39, 0.0 }
 0x12b   :  { %v328_v40 = vpop.eup %327 }
 0x12c   :  { %v189_v42 = vmul.f32 %v328_v40, %v187_v39 }
 0x12e   :  { %v191_v44 = vsel %vm190_vm3, %v187_v39, %v189_v42 }
 0x12f   :  { %v194_v45 = vsel %vm192_vm4, %v193_v43, %v191_v44 }
 0x130   :  { %v196_v48 = vmul.f32 0.47942555, %v194_v45 }
 0x132   :  { %v197_v50 = vsub.f32 %v195_v47, %v196_v48 }
 0x134   :  { %v200_v52 = vsel %vm198_vm5, %v197_v50, %v236_v51 }
 0x135   :  { %v201_v53 = vsel %vm184_vm6, %v200_v52, %v174_v36 }
 0x136   :  { %v202_v54 = vmul.f32 30.0, %v201_v53 }
 0x138   :  { %203 = vst [vmem:[#allocation2] sm:$0xff] %v202_v54 }
 0x139   :  { %340 = shalt.err (!%p337_p4)
}
 0x13a   :  { %s341_s8 = scalar_lea.hbm %s488_s5, 128 }
 0x13b   :  { %p342_p5 = scmp.ne.s32.totalorder %s488_s5, %s341_s8  ;;  %p345_p6 = scmp.lt.u32.totalorder %s341_s8, %s488_s5 }
 0x13d   :  { %p347_p7 = pnand %p345_p6, %p342_p5 }
 0x13f   :  { %350 = shalt.err (!%p347_p7)
}
 0x140   :  { %213 = dma.vmem_to_hbm [thread:$0]  %s211_s1, 128, %s488_s5, [#allocation3]  }
 0x141   :  { %351 = dma.done.wait [#allocation3], 128  }
 0x142   :  { %352 = vsyncadd [#allocation3], 4294967168 }
 0x143   :  { %217 = vsyncpa [#allocation3], 1 }

</bundles_post_ra>
